<compile_context>
chip_gen: v6e
topology: v6e:2x2x1
jax: 0.10.0
libtpu: 0.0.40
codegen_flags: <defaults>
</compile_context>

<pallas_src>
import functools

import jax
import jax.numpy as jnp
from jax.experimental import pallas as pl
from jax.experimental.pallas import tpu as pltpu


def _focal_kernel(logits_ref, targets_ref, weight_ref, out_ref, acc_ref,
                  *, gamma, total_lanes, lanes_per_block, masked):
    j = pl.program_id(1)

    @pl.when(j == 0)
    def _():
        acc_ref[...] = jnp.zeros_like(acc_ref)

    x = logits_ref[0].astype(jnp.float32)          # (C, TL)
    t = targets_ref[0]                             # (1, TL) int32
    w = weight_ref[...].astype(jnp.float32)        # (C, 1)

    if masked:
        lane = (jax.lax.broadcasted_iota(jnp.int32, (1, lanes_per_block), 1)
                + j * lanes_per_block)
        valid = lane < total_lanes                 # (1, TL)
        # keep garbage from a partial boundary block out of max/exp
        x = jnp.where(valid, x, 0.0)

    # numerically stable log-softmax over the class (sublane) axis
    m = jnp.max(x, axis=0, keepdims=True)                           # (1, TL)
    lse = jnp.log(jnp.sum(jnp.exp(x - m), axis=0, keepdims=True)) + m

    # gather target logit / target-class weight via one-hot on the class axis
    cls = jax.lax.broadcasted_iota(jnp.int32, x.shape, 0)            # (C, TL)
    onehot = (cls == t).astype(jnp.float32)                          # (C, TL)
    logit_t = jnp.sum(x * onehot, axis=0, keepdims=True)             # (1, TL)
    w_t = jnp.sum(onehot * w, axis=0, keepdims=True)                 # (1, TL)

    ce = w_t * (lse - logit_t)                                       # weighted NLL
    pt = jnp.exp(-ce)
    one_m_pt = 1.0 - pt
    if gamma == 2.0:                         # default: square, no pow (EUP win)
        mod = one_m_pt * one_m_pt
    elif float(gamma).is_integer() and 0 <= int(gamma) <= 8:
        mod = jnp.ones_like(one_m_pt)
        for _ in range(int(gamma)):
            mod = mod * one_m_pt
    else:
        mod = one_m_pt ** gamma
    focal = mod * ce                                                 # (1, TL)

    if masked:
        focal = jnp.where(valid, focal, 0.0)

    # lane-wise partial sums (pure VPU adds); no per-step cross-lane reduce
    acc_ref[...] += focal

    @pl.when(j == pl.num_programs(1) - 1)
    def _():
        # single cross-lane reduce per image; lane-dense output block
        out_ref[...] = jnp.broadcast_to(jnp.sum(acc_ref[...]), out_ref.shape)


def focal_loss(logits, targets, weight=None, gamma=2.0, *, block_lanes=2048):
    """logits: (N, C, *spatial) float; targets: (N, *spatial) int; weight: (C,) or None."""
    N, C = logits.shape[0], logits.shape[1]
    L = 1
    for s in logits.shape[2:]:
        L *= s
    M = N * L

    # Free views (no transpose, no data movement).
    logits_ncl = logits.reshape(N, C, L)
    targets_n1l = targets.reshape(N, 1, L).astype(jnp.int32)
    if weight is None:
        weight_c1 = jnp.ones((C, 1), jnp.float32)
    else:
        weight_c1 = jnp.asarray(weight, jnp.float32).reshape(C, 1)

    # Lane tile: a multiple of 128 (Mosaic lane constraint) or the full L.
    if L <= block_lanes or L % 128 != 0:
        # TODO(synk): for very large L that is not a multiple of 128, pad the
        # lane axis (plus masking) instead of taking it as a single block.
        tl = L
    else:
        tl = max(128, (block_lanes // 128) * 128)
    n_j = pl.cdiv(L, tl)
    masked = (L % tl) != 0

    kernel = functools.partial(
        _focal_kernel, gamma=float(gamma), total_lanes=L,
        lanes_per_block=tl, masked=masked)

    out = pl.pallas_call(
        kernel,
        out_shape=jax.ShapeDtypeStruct((N, 1, 128), jnp.float32),
        grid_spec=pltpu.PrefetchScalarGridSpec(
            num_scalar_prefetch=0,
            grid=(N, n_j),
            in_specs=[
                pl.BlockSpec((1, C, tl), lambda n, j: (n, 0, j)),
                pl.BlockSpec((1, 1, tl), lambda n, j: (n, 0, j)),
                pl.BlockSpec((C, 1), lambda n, j: (0, 0)),
            ],
            out_specs=pl.BlockSpec((1, 1, 128), lambda n, j: (n, 0, 0)),
            scratch_shapes=[pltpu.VMEM((1, tl), jnp.float32)],
        ),
        compiler_params=pltpu.CompilerParams(
            # batch axis independent (megacore split on v7x); lane-block axis
            # is the reduction into the per-image accumulator.
            dimension_semantics=("parallel", "arbitrary")),
    )(logits_ncl, targets_n1l, weight_c1)

    # tiny final reduce over per-image partials -> mean over all pixels
    return jnp.sum(out[:, 0, 0]) / jnp.float32(M)


def focal_loss_ref(logits, targets, weight=None, gamma=2.0):
    """Pure-JAX reference mirroring F.cross_entropy(..., weight, 'none') + focal."""
    C = logits.shape[1]
    x = jnp.moveaxis(logits, 1, -1).reshape(-1, C).astype(jnp.float32)
    t = targets.reshape(-1).astype(jnp.int32)
    logp = jax.nn.log_softmax(x, axis=-1)
    nll = -jnp.take_along_axis(logp, t[:, None], axis=-1)[:, 0]
    w = jnp.ones((C,), jnp.float32) if weight is None else jnp.asarray(weight, jnp.float32)
    ce = w[t] * nll
    pt = jnp.exp(-ce)
    return jnp.mean((1.0 - pt) ** gamma * ce)


if __name__ == "__main__":
    key = jax.random.PRNGKey(0)
    N, C, H, W = 2, 4, 16, 16
    k1, k2, k3 = jax.random.split(key, 3)
    logits = jax.random.normal(k1, (N, C, H, W), dtype=jnp.float32)
    targets = jax.random.randint(k2, (N, H, W), 0, C, dtype=jnp.int32)
    weight = jnp.linspace(0.5, 2.0, C, dtype=jnp.float32)
    gamma = 2.0

    # 1) single lane-block per image
    out = jax.block_until_ready(focal_loss(logits, targets, weight, gamma))
    ref = focal_loss_ref(logits, targets, weight, gamma)
    assert jnp.allclose(out, ref, rtol=1e-5, atol=1e-5), (out, ref)

    # 2) multi-step reduction over the lane axis (accumulator path)
    out2 = jax.block_until_ready(
        focal_loss(logits, targets, weight, gamma, block_lanes=128))
    assert jnp.allclose(out2, ref, rtol=1e-5, atol=1e-5), (out2, ref)

    # 3) partial boundary block (mask path): L = 16*24 = 384, tile = 256
    logits_b = jax.random.normal(k3, (N, C, 16, 24), dtype=jnp.float32)
    targets_b = jax.random.randint(k2, (N, 16, 24), 0, C, dtype=jnp.int32)
    out3 = jax.block_until_ready(
        focal_loss(logits_b, targets_b, weight, gamma, block_lanes=256))
    ref3 = focal_loss_ref(logits_b, targets_b, weight, gamma)
    assert jnp.allclose(out3, ref3, rtol=1e-5, atol=1e-5), (out3, ref3)

    print("KERNEL_OK")
</pallas_src>

<mosaic_0001>
module attributes {stable_mosaic.version = 11 : i64} {
  func.func @_focal_kernel(%arg0: i32, %arg1: i32, %arg2: memref<1x4x256xf32, #tpu.memory_space<vmem>>, %arg3: memref<1x1x256xi32, #tpu.memory_space<vmem>>, %arg4: memref<4x1xf32, #tpu.memory_space<vmem>>, %arg5: memref<1x1x128xf32, #tpu.memory_space<vmem>>, %arg6: memref<1x256xf32, #tpu.memory_space<vmem>>) attributes {dimension_semantics = [#tpu.dimension_semantics<parallel>, #tpu.dimension_semantics<arbitrary>], iteration_bounds = array<i64: 2, 1>, scalar_prefetch = 0 : i64, scratch_operands = 1 : i64, tpu.core_type = #tpu.core_type<tc>, window_params = [{transform_indices = @transform_0, window_bounds = array<i64: 1, 4, 256>}, {transform_indices = @transform_1, window_bounds = array<i64: 1, 1, 256>}, {pipeline_mode = #tpu.pipeline_mode<synchronous>, transform_indices = @transform_2, window_bounds = array<i64: 4, 1>}, {transform_indices = @transform_3, window_bounds = array<i64: 1, 1, 128>}]} {
    %c0_i32 = arith.constant 0 : i32
    %0 = arith.cmpi eq, %arg1, %c0_i32 : i32
    %1 = arith.extui %0 : i1 to i32
    %c0_i32_0 = arith.constant 0 : i32
    %2 = arith.cmpi ne, %1, %c0_i32_0 : i32
    scf.if %2 {
      %cst_19 = arith.constant 0.000000e+00 : f32
      %44 = vector.broadcast %cst_19 : f32 to vector<1x256xf32>
      %c0_20 = arith.constant 0 : index
      %c0_21 = arith.constant 0 : index
      %45 = vector.load %arg6[%c0_20, %c0_21] : memref<1x256xf32, #tpu.memory_space<vmem>>, vector<1x256xf32>
      tpu.vector_store %arg6[%c0_20, %c0_21], %44 {strides = array<i32>} : memref<1x256xf32, #tpu.memory_space<vmem>>, vector<1x256xf32>,
    } else {
    }
    %c0 = arith.constant 0 : index
    %c0_1 = arith.constant 0 : index
    %c0_2 = arith.constant 0 : index
    %3 = vector.load %arg2[%c0, %c0_1, %c0_2] : memref<1x4x256xf32, #tpu.memory_space<vmem>>, vector<1x4x256xf32>
    %4 = vector.shape_cast %3 : vector<1x4x256xf32> to vector<4x256xf32>
    %c0_3 = arith.constant 0 : index
    %c0_4 = arith.constant 0 : index
    %c0_5 = arith.constant 0 : index
    %5 = vector.load %arg3[%c0_3, %c0_4, %c0_5] : memref<1x1x256xi32, #tpu.memory_space<vmem>>, vector<1x1x256xi32>
    %6 = vector.shape_cast %5 : vector<1x1x256xi32> to vector<1x256xi32>
    %c0_6 = arith.constant 0 : index
    %c0_7 = arith.constant 0 : index
    %7 = vector.load %arg4[%c0_6, %c0_7] : memref<4x1xf32, #tpu.memory_space<vmem>>, vector<4x1xf32>
    %cst = arith.constant dense<0xFF800000> : vector<256xf32>
    %8 = vector.multi_reduction <maximumf>, %4, %cst [0] : vector<4x256xf32> to vector<256xf32>
    %9 = vector.shape_cast %8 : vector<256xf32> to vector<1x256xf32>
    %10 = vector.broadcast %9 : vector<1x256xf32> to vector<4x256xf32>
    %11 = arith.subf %4, %10 : vector<4x256xf32>
    %12 = math.exp %11 : vector<4x256xf32>
    %cst_8 = arith.constant dense<0.000000e+00> : vector<256xf32>
    %13 = vector.multi_reduction <add>, %12, %cst_8 [0] : vector<4x256xf32> to vector<256xf32>
    %14 = vector.shape_cast %13 : vector<256xf32> to vector<1x256xf32>
    %15 = math.log %14 : vector<1x256xf32>
    %16 = arith.addf %15, %9 : vector<1x256xf32>
    %17 = tpu.iota {dimensions = array<i32: 0>} : vector<4x256xi32>
    %18 = vector.broadcast %6 : vector<1x256xi32> to vector<4x256xi32>
    %19 = arith.cmpi eq, %17, %18 : vector<4x256xi32>
    %20 = arith.extui %19 : vector<4x256xi1> to vector<4x256xi32>
    %21 = arith.sitofp %20 : vector<4x256xi32> to vector<4x256xf32>
    %22 = arith.mulf %4, %21 : vector<4x256xf32>
    %cst_9 = arith.constant dense<0.000000e+00> : vector<256xf32>
    %23 = vector.multi_reduction <add>, %22, %cst_9 [0] : vector<4x256xf32> to vector<256xf32>
    %24 = vector.shape_cast %23 : vector<256xf32> to vector<1x256xf32>
    %25 = vector.broadcast %7 : vector<4x1xf32> to vector<4x256xf32>
    %26 = arith.mulf %21, %25 : vector<4x256xf32>
    %cst_10 = arith.constant dense<0.000000e+00> : vector<256xf32>
    %27 = vector.multi_reduction <add>, %26, %cst_10 [0] : vector<4x256xf32> to vector<256xf32>
    %28 = vector.shape_cast %27 : vector<256xf32> to vector<1x256xf32>
    %29 = arith.subf %16, %24 : vector<1x256xf32>
    %30 = arith.mulf %28, %29 : vector<1x256xf32>
    %cst_11 = arith.constant 0.000000e+00 : f32
    %31 = vector.broadcast %cst_11 : f32 to vector<1x256xf32>
    %32 = arith.subf %31, %30 : vector<1x256xf32>
    %33 = math.exp %32 : vector<1x256xf32>
    %cst_12 = arith.constant 1.000000e+00 : f32
    %34 = vector.broadcast %cst_12 : f32 to vector<1x256xf32>
    %35 = arith.subf %34, %33 : vector<1x256xf32>
    %36 = arith.mulf %35, %35 : vector<1x256xf32>
    %37 = arith.mulf %36, %30 : vector<1x256xf32>
    %c0_13 = arith.constant 0 : index
    %c0_14 = arith.constant 0 : index
    %38 = vector.load %arg6[%c0_13, %c0_14] : memref<1x256xf32, #tpu.memory_space<vmem>>, vector<1x256xf32>
    %39 = arith.addf %38, %37 : vector<1x256xf32>
    %c0_15 = arith.constant 0 : index
    %c0_16 = arith.constant 0 : index
    %40 = vector.load %arg6[%c0_15, %c0_16] : memref<1x256xf32, #tpu.memory_space<vmem>>, vector<1x256xf32>
    tpu.vector_store %arg6[%c0_15, %c0_16], %39 {strides = array<i32>} : memref<1x256xf32, #tpu.memory_space<vmem>>, vector<1x256xf32>,
    %c0_i32_17 = arith.constant 0 : i32
    %41 = arith.cmpi eq, %arg1, %c0_i32_17 : i32
    %42 = arith.extui %41 : i1 to i32
    %c0_i32_18 = arith.constant 0 : i32
    %43 = arith.cmpi ne, %42, %c0_i32_18 : i32
    scf.if %43 {
      %c0_19 = arith.constant 0 : index
      %c0_20 = arith.constant 0 : index
      %44 = vector.load %arg6[%c0_19, %c0_20] : memref<1x256xf32, #tpu.memory_space<vmem>>, vector<1x256xf32>
      %45 = vector.shape_cast %44 : vector<1x256xf32> to vector<1x1x256xf32>
      %cst_21 = arith.constant dense<0.000000e+00> : vector<1xf32>
      %46 = vector.multi_reduction <add>, %45, %cst_21 [1, 2] : vector<1x1x256xf32> to vector<1xf32>
      %47 = vector.shape_cast %46 : vector<1xf32> to vector<1x1x1xf32>
      %48 = vector.extract %47[0, 0, 0] : f32 from vector<1x1x1xf32>
      %49 = vector.broadcast %48 : f32 to vector<1x1x128xf32>
      %c0_22 = arith.constant 0 : index
      %c0_23 = arith.constant 0 : index
      %c0_24 = arith.constant 0 : index
      %50 = vector.load %arg5[%c0_22, %c0_23, %c0_24] : memref<1x1x128xf32, #tpu.memory_space<vmem>>, vector<1x1x128xf32>
      tpu.vector_store %arg5[%c0_22, %c0_23, %c0_24], %49 {strides = array<i32>} : memref<1x1x128xf32, #tpu.memory_space<vmem>>, vector<1x1x128xf32>,
    } else {
    }
    return
  }
  func.func @transform_0(%arg0: i32, %arg1: i32) -> (i32, i32, i32) {
    %c0_i32 = arith.constant 0 : i32
    %c0_i32_0 = arith.constant 0 : i32
    return %arg0, %c0_i32, %arg1 : i32, i32, i32
  }
  func.func @transform_1(%arg0: i32, %arg1: i32) -> (i32, i32, i32) {
    %c0_i32 = arith.constant 0 : i32
    %c0_i32_0 = arith.constant 0 : i32
    return %arg0, %c0_i32, %arg1 : i32, i32, i32
  }
  func.func @transform_2(%arg0: i32, %arg1: i32) -> (i32, i32) {
    %c0_i32 = arith.constant 0 : i32
    %c0_i32_0 = arith.constant 0 : i32
    %c0_i32_1 = arith.constant 0 : i32
    return %c0_i32, %c0_i32_0 : i32, i32
  }
  func.func @transform_3(%arg0: i32, %arg1: i32) -> (i32, i32, i32) {
    %c0_i32 = arith.constant 0 : i32
    %c0_i32_0 = arith.constant 0 : i32
    %c0_i32_1 = arith.constant 0 : i32
    return %arg0, %c0_i32, %c0_i32_0 : i32, i32, i32
  }
}

</mosaic_0001>

<bundles_post_ra>
// kernel: tpu_custom_call.1
= control target key start
LH: loop header
LB: loop body
LE: loop exit
PB: predicated region body
PF: predicated region fallthrough
CT: control target
= control target key end

     0   :  { %8 = vsyncpa [#allocation4], 0  ;;  %s941_s0 = inlined_call_operand.hbm [shape: f32[2,4,256], index: 0, kind: input, shape index: {}]   ;;  %s942_s1 = inlined_call_operand.vmem [shape: s32[2,1,256], index: 1, kind: input, shape index: {}]   ;;  %s943_s2 = inlined_call_operand.vmem [shape: f32[4,1], index: 2, kind: input, shape index: {}]   ;;  %s944_s3 = inlined_call_operand.hbm [shape: f32[2,1,128], index: 3, kind: output, shape index: {}]  }
   0x1   :  { %10 = vsyncpa [#allocation4 + $0x1], 0 }
   0x2   :  { %11 = vsyncpa [#allocation5], 0 }
   0x3   :  { %13 = vsyncpa [#allocation5 + $0x1], 0  ;;  %s761_s12 = smov 0   ;;  %s763_s13 = smov 0  }
   0x4   :  { %s765_s14 = smov 0   ;;  %s767_s15 = smov 0  }
   0x5   :  { %s769_s16 = smov 0   ;;  %s771_s17 = smov 0  }
   0x6 LB: > { %s531_s18 = sadd.s32 4294967295, %s734_s17   ;;  %s532_s19 = sadd.s32 4294967294, %s734_s17   ;;  %s734_s17 = sphi %s771_s17, %s19_s17   ;;  %s730_s16 = sphi %s769_s16, %s958_s16   ;;  %s726_s15 = sphi %s767_s15, %s957_s15   ;;  %s722_s14 = sphi %s765_s14, %s956_s14   ;;  %s718_s13 = sphi %s763_s13, %s955_s13   ;;  %s714_s12 = sphi %s761_s12, %s954_s12  }
   0x7   : > { %s31_s20 = sadd.s32 1, %s730_s16  ;;  %s40_s21 = sadd.s32 1, %s722_s14 }
   0x8   : > { %p33_p0 = scmp.ge.s32.totalorder %s31_s20, 2  ;;  %p47_p1 = scmp.ne.s32.totalorder %s722_s14, %s718_s13 }
   0x9   : > { %p48_p2 = scmp.eq.s32.totalorder %s734_s17, 0  ;;  %p53_p3 = scmp.ne.s32.totalorder %s718_s13, %s714_s12 }
   0xa   : > { %s960_s20 = smov (%p33_p0, %s31_s20), 0  ;;  %p54_p5 = scmp.eq.s32.totalorder %s531_s18, 0 }
   0xb   : > { %p802_p4 = por %p48_p2, %p47_p1  ;;  %s35_s23 = ssub.s32 %s730_s16, %s960_s20 }
   0xc   : > { %p126_p6 = scmp.eq.s32.totalorder %s531_s18, 1  ;;  %p38_p7 = scmp.eq.s32.totalorder %s35_s23, 0 }
   0xd   : > { %p808_p8 = por %p54_p5, %p53_p3  ;;  %p132_p10 = scmp.eq.s32.totalorder %s532_s19, 1 }
   0xe   : > { %p812_p9 = por %p126_p6, %p47_p1  ;;  %p561_p13 = scmp.lt.s32.totalorder %s734_s17, 2 }
   0xf   : > { %s817_s26 = scalar_select %p38_p7, %s722_s14, %s40_s21  }
  0x10   : > { %p819_p11 = por %p132_p10, %p53_p3  ;;  %s155_s28 = sand.u32 1, %s722_s14  }
  0x11   : > { %s535_s29 = sshll.u32 %s155_s28, 3  ;;  %s546_s30 = sshll.u32 %s730_s16, 7 }
  0x12   : > { %s948_s27 = scalar_select %p819_p11, 1, 0 }
  0x13   : > { %s167_s6 = scalar_lea.hbm %s941_s0, %s546_s30  ;;  %s159_s7 = scalar_lea.vmem [#allocation3], %s535_s29 }
  0x14   : > { %s169_s8 = sshll.u32 %s159_s7, 4  ;;  %p832_p0 = pnand %p561_p13, %p802_p4  ;;  %s170_s8 = int_to_ptr.vmem [resolvable:$true] %s169_s8 }
  0x15   : > { %p538_p1 = scmp.ge.s32.totalorder %s734_s17, 1  ;;  %p186_p2 = scmp.lt.s32.totalorder %s734_s17, 3 }
  0x16   : > { %s156_s10 = scalar_lea.sflag [#allocation4], %s155_s28  ;;  %p628_p3 = pneg %p832_p0 }
  0x17   : > { %s639_s11 = scalar_lea.vmem %s170_s8, 128  ;;  %s736_s18 = smov [#allocation3]  }
  0x18   : > { %p640_p5 = scmp.ne.s32.totalorder %s170_s8, %s639_s11  ;;  %s644_s19 = sshll.u32 %s736_s18, 4  ;;  %s645_s19 = int_to_ptr.vmem [resolvable:$false] %s644_s19 }
  0x19   : > { %s646_s21 = scalar_lea.vmem %s645_s19, 256  ;;  %p647_p10 = scmp.lt.s32.totalorder %s170_s8, %s645_s19 }
  0x1a   : > { %p642_p6 = pnand %p640_p5, %p628_p3  ;;  %p648_p12 = scmp.lt.s32.totalorder %s646_s21, %s639_s11 }
  0x1c   : > { %p643_p7 = pneg %p642_p6  ;;  %p649_p4 = por %p648_p12, %p647_p10 }
  0x1e   : > { %p650_p13 = pnand %p649_p4, %p643_p7 }
  0x20   : > { %653 = shalt.err (!%p650_p13)
}
  0x21   : > { %556 = dma.hbm_to_vmem [thread:$0]  (!%p832_p0), %s167_s6, 128, %s170_s8, %s156_s10  }
  0x22   : > { %p187_p11 = pnand %p538_p1, %p186_p2 }
  0x23   : > { %s847_s22 = sand.u32 (!%p187_p11), 1, %s718_s13  }
  0x24   : > { %190 = sbr.rel (%p187_p11) target bundleno = 445 (0x1bd), region = 32  ;;  %s539_s23 = sshll.u32 (!%p187_p11), %s847_s22, 3 }
  0x25   : > { %s193_s28 = scalar_lea.sflag (!%p187_p11), [#allocation4], %s847_s22  ;;  %s196_s29 = scalar_lea.vmem (!%p187_p11), [#allocation3], %s539_s23 }
  0x29   : > { %705 = dma.done.wait (%p808_p8), %s193_s28, 128  }
  0x2a   : > { %707 = vsyncadd (%p808_p8), %s193_s28, 4294967168  ;;  %p228_p12 = scmp.lt.s32.totalorder %s726_s15, 1  ;;  %v240_v0 = vlaneseq  ;;  %v737_v1 = vmov 0   ;;  %v738_v4 = vmov 0.0   ;;  %v247_v7 = vld [vmem:[%s943_s2] sm:$0xf] }
  0x2b   : > { %614 = vset.pattern.permute.xlu0 %v737_v1  ;;  %v245_v14 = vld [vmem:[%s196_s29] sm:$0xff]  ;;  %vm251_vm3 = vcmask 1043456   ;;  %vm411_vm4 = vcmask 1040384   ;;  %s225_s9 = scalar_lea.vmem [#allocation6], %s847_s22  ;;  %s543_s11 = sshll.u32 %s726_s15, 4 }
  0x2c   : > { %s229_s30 = scalar_select %p228_p12, %s726_s15, 1  ;;  %vm857_vm0 = vcmp.lt.s32.totalorder %v240_v0, 256  ;;  %v861_v3 = vshrl.u32 %v240_v0, 7  ;;  %336 = vperm.xlu0 %614, %v247_v7   ;;  %v249_v15 = vcombine.high %v245_v14, %v245_v14  ;;  %v252_v16 = vsel %vm251_vm3, %v245_v14, -inf }
  0x2d   : > { %244 = vst.msk [vmem:[#allocation2] sm:$0x3] %vm857_vm0, %v738_v4  ;;  %v253_v18 = vrot.slane %v252_v16, 4  ;;  %s439_s10 = sshll.u32 %s225_s9, 4  ;;  %s437_s23 = scalar_lea.hbm %s944_s3, %s543_s11  ;;  %s896_s10 = int_to_ptr.vmem [resolvable:$true] %s439_s10 }
  0x2e   : > { %s540_s4 = sshll.u32 %s229_s30, 1  ;;  %v300_v5 = vsub.s32 0, %v861_v3  ;;  %v304_v6 = vsub.s32 1, %v861_v3  ;;  %v259_v17 = vsel %vm251_vm3, %v249_v15, -inf  ;;  %s427_s28 = scalar_lea.sflag [#allocation5], %s847_s22 }
  0x2f   : > { %s234_s6 = scalar_lea.vmem %s942_s1, %s540_s4  ;;  %v260_v19 = vrot.slane %v259_v17, 4  ;;  %v254_v20 = vmax.f32 %v252_v16, %v253_v18  ;;  %s654_s29 = scalar_lea.vmem %s896_s10, 16 }
  0x30   : > { %v246_v8 = vld [vmem:[%s234_s6] sm:$0x3]  ;;  %p655_p8 = scmp.ne.s32.totalorder %s896_s10, %s654_s29  ;;  %s740_s30 = smov [#allocation6]  }
  0x31   : > { %v301_v9 = vrot.slane %v246_v8, %v300_v5  ;;  %v305_v10 = vrot.slane %v246_v8, %v304_v6  ;;  %v261_v21 = vmax.f32 %v259_v17, %v260_v19  ;;  %v255_v22 = vrot.slane %v254_v20, 2  ;;  %s658_s15 = sshll.u32 %s740_s30, 4  ;;  %s659_s15 = int_to_ptr.vmem [resolvable:$false] %s658_s15 }
  0x32   : > { %p656_p11 = pnand %p655_p8, %p812_p9  ;;  %s660_s4 = scalar_lea.vmem %s659_s15, 32 }
  0x33   : > { %vm306_vm1 = vcmp.eq.s32.totalorder %v861_v3, %v301_v9  ;;  %vm307_vm2 = vcmp.eq.s32.totalorder %v861_v3, %v305_v10  ;;  %v262_v23 = vrot.slane %v261_v21, 2  ;;  %v256_v24 = vmax.f32 %v254_v20, %v255_v22  ;;  %p661_p1 = scmp.lt.s32.totalorder %s896_s10, %s659_s15  ;;  %p662_p2 = scmp.lt.s32.totalorder %s660_s4, %s654_s29 }
  0x34   : > { %v541_v11 = vsel %vm306_vm1, 1.0, %v738_v4  ;;  %v542_v12 = vsel %vm307_vm2, 1.0, %v738_v4  ;;  %p657_p0 = pneg %p656_p11 }
  0x35   : > { %v314_v13 = vcombine.low %v541_v11, %v542_v12  ;;  %v263_v25 = vmax.f32 %v261_v21, %v262_v23  ;;  %v257_v26 = vrot.slane %v256_v24, 1  ;;  %p663_p3 = por %p662_p2, %p661_p1 }
  0x37   : > { %v264_v27 = vrot.slane %v263_v25, 1  ;;  %v258_v28 = vmax.f32 %v256_v24, %v257_v26  ;;  %v316_v45 = vmul.f32 %v314_v13, %v245_v14  ;;  %p664_p5 = pnand %p663_p3, %p657_p0 }
  0x39   : > { %v265_v29 = vmax.f32 %v263_v25, %v264_v27  ;;  %v318_v48 = vcombine.high %v316_v45, %v316_v45  ;;  %v320_v51 = vsel %vm251_vm3, %v316_v45, 0.0 }
  0x3a   : > { %v321_v53 = vrot.slane %v320_v51, 4 }
  0x3b   : > { %v268_v30 = vcombine.low %v258_v28, %v265_v29  ;;  %v327_v52 = vsel %vm251_vm3, %v318_v48, 0.0 }
  0x3c   : > { %v328_v54 = vrot.slane %v327_v52, 4  ;;  %v322_v55 = vadd.f32 %v321_v53, %v320_v51 }
  0x3d   : > { %v270_v31 = vsub.f32 %v245_v14, %v268_v30 }
  0x3e   : > { %v329_v56 = vadd.f32 %v328_v54, %v327_v52  ;;  %v323_v57 = vrot.slane %v322_v55, 2 }
  0x3f   : > { %v271_v32 = vmul.f32 1.442695, %v270_v31 }
  0x40   : > { %v330_v58 = vrot.slane %v329_v56, 2  ;;  %v324_v59 = vadd.f32 %v323_v57, %v322_v55 }
  0x41   : > { %616 = vpow2.f32 %v271_v32 }
  0x42   : > { %v331_v60 = vadd.f32 %v330_v58, %v329_v56  ;;  %v325_v4 = vrot.slane %v324_v59, 1 }
  0x44   : > { %v332_v7 = vrot.slane %v331_v60, 1  ;;  %v326_v18 = vadd.f32 %v325_v4, %v324_v59 }
  0x46   : > { %v333_v19 = vadd.f32 %v332_v7, %v331_v60 }
  0x4e   : > { %v617_v33 = vpop.eup %616 }
  0x4f   : > { %v274_v34 = vcombine.high %v617_v33, %v617_v33  ;;  %v276_v35 = vsel %vm251_vm3, %v617_v33, 0.0 }
  0x50   : > { %v277_v37 = vrot.slane %v276_v35, 4 }
  0x51   : > { %v283_v36 = vsel %vm251_vm3, %v274_v34, 0.0 }
  0x52   : > { %v284_v38 = vrot.slane %v283_v36, 4  ;;  %v278_v39 = vadd.f32 %v277_v37, %v276_v35 }
  0x54   : > { %v285_v40 = vadd.f32 %v284_v38, %v283_v36  ;;  %v279_v41 = vrot.slane %v278_v39, 2 }
  0x56   : > { %v286_v42 = vrot.slane %v285_v40, 2  ;;  %v280_v43 = vadd.f32 %v279_v41, %v278_v39 }
  0x58   : > { %v287_v44 = vadd.f32 %v286_v42, %v285_v40  ;;  %v281_v46 = vrot.slane %v280_v43, 1 }
  0x5a   : > { %v288_v47 = vrot.slane %v287_v44, 1  ;;  %v282_v49 = vadd.f32 %v281_v46, %v280_v43 }
  0x5c   : > { %v289_v50 = vadd.f32 %v288_v47, %v287_v44  ;;  %618 = vlog2.f32 %v282_v49 }
  0x5e   : > { %620 = vlog2.f32 %v289_v50  ;;  %v371_v50 = vld [vmem:[#allocation2] sm:$0x3] }
  0x69   : > { %v619_v61 = vpop.eup %618 }
  0x6a   : > { %v291_v10 = vmul.f32 0.6931472, %v619_v61 }
  0x6b   : > { %v621_v63 = vpop.eup %620 }
  0x6c   : > { %v293_v13 = vmul.f32 0.6931472, %v621_v63  ;;  %v294_v20 = vadd.f32 %v291_v10, %v258_v28  ;;  %v739_v28 = vmov 1966171168  }
  0x6e   : > { %v295_v21 = vadd.f32 %v293_v13, %v265_v29  ;;  %v355_v26 = vsub.f32 %v294_v20, %v326_v18  ;;  %v376_v29 = vunpack.c.l.s4 %v739_v28 }
  0x70   : > { %v356_v27 = vsub.f32 %v295_v21, %v333_v19  ;;  %v377_v41 = vunpack.c.0.s8 %v376_v29 }
  0x72   : > { %v380_v46 = vsub.s32 %v377_v41, %v861_v3 }
  0xa7   : > { %v337_v62 = vpop.permute.xlu0 %336 }
  0xa8   : > { %v339_v0 = vmul.f32 %v541_v11, %v337_v62  ;;  %v340_v1 = vmul.f32 %v542_v12, %v337_v62 }
  0xaa   : > { %v341_v8 = vsel %vm251_vm3, %v339_v0, 0.0  ;;  %v348_v9 = vsel %vm251_vm3, %v340_v1, 0.0 }
  0xab   : > { %v342_v14 = vrot.slane %v341_v8, 4  ;;  %v349_v15 = vrot.slane %v348_v9, 4 }
  0xad   : > { %v343_v16 = vadd.f32 %v342_v14, %v341_v8  ;;  %v350_v17 = vadd.f32 %v349_v15, %v348_v9 }
  0xaf   : > { %v344_v22 = vrot.slane %v343_v16, 2  ;;  %v351_v23 = vrot.slane %v350_v17, 2 }
  0xb1   : > { %v345_v11 = vadd.f32 %v344_v22, %v343_v16  ;;  %v352_v12 = vadd.f32 %v351_v23, %v350_v17 }
  0xb3   : > { %v346_v24 = vrot.slane %v345_v11, 1  ;;  %v353_v25 = vrot.slane %v352_v12, 1 }
  0xb5   : > { %v347_v30 = vadd.f32 %v346_v24, %v345_v11  ;;  %v354_v31 = vadd.f32 %v353_v25, %v352_v12 }
  0xb7   : > { %v357_v32 = vmul.f32 %v355_v26, %v347_v30  ;;  %v358_v33 = vmul.f32 %v356_v27, %v354_v31 }
  0xb9   : > { %v359_v34 = vsub.f32 0.0, %v357_v32  ;;  %v360_v35 = vsub.f32 0.0, %v358_v33 }
  0xbb   : > { %v361_v36 = vmul.f32 1.442695, %v359_v34  ;;  %v363_v37 = vmul.f32 1.442695, %v360_v35 }
  0xbd   : > { %622 = vpow2.f32 %v361_v36 }
  0xbe   : > { %624 = vpow2.f32 %v363_v37 }
  0xca   : > { %v623_v38 = vpop.eup %622 }
  0xcb   : > { %v625_v39 = vpop.eup %624  ;;  %v365_v40 = vsub.f32 1.0, %v623_v38 }
  0xcc   : > { %v366_v42 = vsub.f32 1.0, %v625_v39 }
  0xcd   : > { %v367_v43 = vmul.f32 %v365_v40, %v365_v40 }
  0xce   : > { %v368_v44 = vmul.f32 %v366_v42, %v366_v42 }
  0xcf   : > { %v369_v45 = vmul.f32 %v367_v43, %v357_v32 }
  0xd0   : > { %v370_v47 = vmul.f32 %v368_v44, %v358_v33 }
  0xd2   : > { %v374_v48 = vcombine.low %v369_v45, %v370_v47 }
  0xd4   : > { %v381_v49 = vrot.slane %v374_v48, %v380_v46 }
  0xd6   : > { %v388_v51 = vrot.slane %v381_v49, %v380_v46 }
  0xd8   : > { %v390_v52 = vadd.f32 %v388_v51, %v371_v50 }
  0xda   : > { %395 = vst.msk [vmem:[#allocation2] sm:$0x3] %vm857_vm0, %v390_v52 }
  0xe1   : > { %v399_v53 = vld [vmem:[#allocation2] sm:$0x3] }
  0xe2   : > { %v404_v54 = vrot.slane %v399_v53, %v300_v5  ;;  %v408_v55 = vrot.slane %v399_v53, %v304_v6 }
  0xe4   : > { %v412_v56 = vsel %vm411_vm4, %v404_v54, 0.0  ;;  %v413_v57 = vsel %vm411_vm4, %v408_v55, 0.0 }
  0xe5   : > { %v414_v58 = vadd.f32 %v413_v57, %v412_v56 }
  0xe7   : > { %415 = vadd.xlane.f32.xlu0 %v414_v58 }
 0x170   : > { %v416_v59 = vpop.xlane.xlu0 %415 }
 0x171   : > { %v417_v60 = vrot.slane %v416_v59, 4 }
 0x173   : > { %v418_v61 = vadd.f32 %v417_v60, %v416_v59 }
 0x175   : > { %v419_v2 = vrot.slane %v418_v61, 2 }
 0x177   : > { %v420_v62 = vadd.f32 %v419_v2, %v418_v61 }
 0x179   : > { %v421_v63 = vrot.slane %v420_v62, 1 }
 0x17b   : > { %v422_v0 = vadd.f32 %v421_v63, %v420_v62 }
 0x17d   : > { %547 = vpush %v422_v0 }
 0x1ae   : > { %s548_s18 = spop %547 }
 0x1af   : > { %v424_v3 = vstv %s548_s18 }
 0x1b0   : > { %425 = vst [vmem:[%s225_s9] sm:$0x1] %v424_v3 }
 0x1b1   : > { %667 = shalt.err (!%p664_p5)
}
 0x1b2   : > { %s668_s24 = scalar_lea.hbm %s437_s23, 16  ;;  %s672_s6 = scalar_lea.hbm %s944_s3, 32 }
 0x1b3   : > { %p669_p6 = scmp.ne.s32.totalorder %s437_s23, %s668_s24  ;;  %p673_p4 = scmp.lt.s32.totalorder %s437_s23, %s944_s3 }
 0x1b4   : > { %p674_p13 = scmp.lt.s32.totalorder %s672_s6, %s668_s24 }
 0x1b5   : > { %p670_p7 = pnand %p669_p6, %p812_p9 }
 0x1b6   : > { %p675_p12 = por %p674_p13, %p673_p4 }
 0x1b7   : > { %p671_p10 = pneg %p670_p7 }
 0x1b9   : > { %p676_p8 = pnand %p675_p12, %p671_p10 }
 0x1bb   : > { %679 = shalt.err (!%p676_p8)
}
 0x1bc   : > { %551 = dma.vmem_to_hbm [thread:$0]  (%p812_p9), %s896_s10, 16, %s437_s23, %s427_s28  }
 0x1bd PF: > { %s451_s9 = sand.u32 1, %s714_s12   ;;  %p952_p11 = scmp.ne.s32.totalorder %s948_s27, 0 }
 0x1be   : > { %p953_p0 = scmp.ge.s32.totalorder %s734_s17, 2  ;;  %s452_s11 = scalar_lea.sflag [#allocation5], %s451_s9 }
 0x1c0   : > { %p558_p1 = pnand %p953_p0, %p952_p11 }
 0x1c2   : > { %p559_p2 = pneg %p558_p1 }
 0x1c4   : > { %709 = dma.done.wait (%p559_p2), %s452_s11, 16  }
 0x1c5   : > { %711 = vsyncadd (%p559_p2), %s452_s11, 4294967280  ;;  %s19_s17 = sadd.s32 1, %s734_s17   ;;  %s954_s12 = smov %s718_s13 }
 0x1c6   : > { %p16_p3 = scmp.ge.s32.totalorder %s19_s17, 4   ;;  %s955_s13 = smov %s722_s14 }
 0x1c7   : > { %s956_s14 = smov %s817_s26  ;;  %s957_s15 = smov %s730_s16 }
 0x1c8   : > { %s958_s16 = smov %s960_s20  ;;  %18 = sbr.rel (!%p16_p3) target bundleno = 6 (0x6), region = 88 }
 0x1cd   :  { %456 = vsyncpa [#allocation4], 1 }
 0x1ce   :  { %458 = vsyncpa [#allocation4 + $0x1], 1 }
 0x1cf   :  { %459 = vsyncpa [#allocation5], 1 }
 0x1d0   :  { %461 = vsyncpa [#allocation5 + $0x1], 1 }

</bundles_post_ra>
